<compile_context>
chip_gen: v6e
topology: v6e:2x2x1
jax: 0.10.0
libtpu: 0.0.40
codegen_flags: <defaults>
</compile_context>

<pallas_src>
from functools import partial

import jax
import jax.numpy as jnp
from jax.experimental import pallas as pl
from jax.experimental.pallas import tpu as pltpu

TOKEN_SELF_ATTN_VALUE = -50000.0


# ----------------------------------------------------------------------------
# Pallas kernel #1: tiled matmul (+ optional bias) for the Linear projections
# ----------------------------------------------------------------------------
def _matmul_kernel(x_ref, w_ref, o_ref):
    o_ref[...] = jnp.dot(
        x_ref[...], w_ref[...], preferred_element_type=jnp.float32
    ).astype(o_ref.dtype)


def _matmul_bias_kernel(x_ref, w_ref, b_ref, o_ref):
    acc = jnp.dot(x_ref[...], w_ref[...], preferred_element_type=jnp.float32)
    o_ref[...] = (acc + b_ref[...]).astype(o_ref.dtype)


def pallas_linear(x2d, w, b=None, *, m_blocks=2):
    """(M, K) @ (K, N) [+ (N,)] -> (M, N) on the MXU.

    M is tiled into `m_blocks` parallel grid steps: both TensorCores stay busy
    on v7x, and on single-TC v5e/v6e it is only a 2-step loop.
    """
    M, K = x2d.shape
    N = w.shape[1]
    assert M % m_blocks == 0
    tm = M // m_blocks
    cp = pltpu.CompilerParams(dimension_semantics=("parallel",))
    if b is None:
        return pl.pallas_call(
            _matmul_kernel,
            out_shape=jax.ShapeDtypeStruct((M, N), jnp.float32),
            grid=(m_blocks,),
            in_specs=[
                pl.BlockSpec((tm, K), lambda i: (i, 0)),
                pl.BlockSpec((K, N), lambda i: (0, 0)),
            ],
            out_specs=pl.BlockSpec((tm, N), lambda i: (i, 0)),
            compiler_params=cp,
        )(x2d, w)
    b2 = b.reshape(1, N)
    return pl.pallas_call(
        _matmul_bias_kernel,
        out_shape=jax.ShapeDtypeStruct((M, N), jnp.float32),
        grid=(m_blocks,),
        in_specs=[
            pl.BlockSpec((tm, K), lambda i: (i, 0)),
            pl.BlockSpec((K, N), lambda i: (0, 0)),
            pl.BlockSpec((1, N), lambda i: (0, 0)),
        ],
        out_specs=pl.BlockSpec((tm, N), lambda i: (i, 0)),
        compiler_params=cp,
    )(x2d, w, b2)


# ----------------------------------------------------------------------------
# Pallas kernel #2: per-chunk LSH attention (normalise, QK^T, mask, softmax, PV)
# ----------------------------------------------------------------------------
def _lsh_chunk_attn_kernel(bqk_ref, bv_ref, bqt_ref, bo_ref, lse_ref):
    # Blocks: bqk/bv (G, C, W, D)  bq_t (G, C, W) int32
    bqk = bqk_ref[...]          # un-normalised qk (q and k share the source)
    bv = bv_ref[...]
    bq_t = bqt_ref[...]

    G, C, W, D = bqk.shape

    # Key L2-normalisation, done ONCE on the un-duplicated keys, via rsqrt:
    # x / max(||x||_2, 1e-12) == x * rsqrt(max(sum(x*x), 1e-24))
    sumsq = jnp.sum(bqk * bqk, axis=-1, keepdims=True)
    bk = bqk * jax.lax.rsqrt(jnp.maximum(sumsq, 1e-24))
    # Queries with the 1/sqrt(dh) scale folded in (W*D mults, not W*2W dots).
    bq = bqk * (D ** -0.5)

    # look_one_back reconstructed in VMEM (previous chunk, wrapped).
    bk_prev = jnp.concatenate([bk[:, -1:], bk[:, :-1]], axis=1)
    bv_prev = jnp.concatenate([bv[:, -1:], bv[:, :-1]], axis=1)
    bt_prev = jnp.concatenate([bq_t[:, -1:], bq_t[:, :-1]], axis=1)

    # Flatten (G, C) into one batch axis for the batched contractions.
    q3 = bq.reshape(G * C, W, D)
    k3 = bk.reshape(G * C, W, D)
    kp3 = bk_prev.reshape(G * C, W, D)
    v3 = bv.reshape(G * C, W, D)
    vp3 = bv_prev.reshape(G * C, W, D)
    t3 = bq_t.reshape(G * C, W)
    tp3 = bt_prev.reshape(G * C, W)

    dots_c = jnp.einsum('bqd,bkd->bqk', q3, k3,
                        preferred_element_type=jnp.float32)
    dots_p = jnp.einsum('bqd,bkd->bqk', q3, kp3,
                        preferred_element_type=jnp.float32)

    # self-token masking (token never attends to itself except as fallback)
    dots_c = jnp.where(t3[:, :, None] == t3[:, None, :],
                       TOKEN_SELF_ATTN_VALUE, dots_c)
    dots_p = jnp.where(t3[:, :, None] == tp3[:, None, :],
                       TOKEN_SELF_ATTN_VALUE, dots_p)

    # Single-exp log-sum-exp softmax over the 2W keys (current + look-back).
    m = jnp.maximum(jnp.max(dots_c, axis=-1, keepdims=True),
                    jnp.max(dots_p, axis=-1, keepdims=True))
    e_c = jnp.exp(dots_c - m)
    e_p = jnp.exp(dots_p - m)
    s = (jnp.sum(e_c, axis=-1, keepdims=True)
         + jnp.sum(e_p, axis=-1, keepdims=True))
    lse = m + jnp.log(s)

    # p @ v == (e @ v) / s  -> divide once per (query, D) via approx reciprocal
    num = (jnp.einsum('bqk,bkd->bqd', e_c, v3,
                      preferred_element_type=jnp.float32)
           + jnp.einsum('bqk,bkd->bqd', e_p, vp3,
                        preferred_element_type=jnp.float32))
    bo = num * pl.reciprocal(s, approx=True)

    bo_ref[...] = bo.reshape(G, C, W, D).astype(bo_ref.dtype)
    lse_ref[...] = lse[..., 0].reshape(G, C, W).astype(lse_ref.dtype)


def lsh_chunk_attention(bqk, bv, bq_t, *, bh_blocks=2):
    BH, C, W, D = bqk.shape
    assert BH % bh_blocks == 0
    G = BH // bh_blocks
    return pl.pallas_call(
        _lsh_chunk_attn_kernel,
        out_shape=(
            jax.ShapeDtypeStruct((BH, C, W, D), jnp.float32),
            jax.ShapeDtypeStruct((BH, C, W), jnp.float32),
        ),
        grid=(bh_blocks,),
        in_specs=[
            pl.BlockSpec((G, C, W, D), lambda i: (i, 0, 0, 0)),
            pl.BlockSpec((G, C, W, D), lambda i: (i, 0, 0, 0)),
            pl.BlockSpec((G, C, W), lambda i: (i, 0, 0)),
        ],
        out_specs=(
            pl.BlockSpec((G, C, W, D), lambda i: (i, 0, 0, 0)),
            pl.BlockSpec((G, C, W), lambda i: (i, 0, 0)),
        ),
        compiler_params=pltpu.CompilerParams(
            dimension_semantics=("parallel",)),
    )(bqk, bv, bq_t)


# ----------------------------------------------------------------------------
# Full forward pass (glue in plain JAX)
# ----------------------------------------------------------------------------
def lsh_self_attention_forward(x, params, *, heads, bucket_size, n_hashes,
                               rot_key):
    b, t, e = x.shape
    dh = e // heads
    dim_heads = dh * heads

    # ---- fused qk/v projection (one Pallas matmul instead of two) ----
    x2d = x.reshape(b * t, e)
    w_qkv = jnp.concatenate([params["w_qk"], params["w_v"]], axis=1)
    qkv = pallas_linear(x2d, w_qkv)                       # (b*t, 2*dim_heads)
    qk = qkv[:, :dim_heads].reshape(b, t, dim_heads)
    v = qkv[:, dim_heads:].reshape(b, t, dim_heads)

    # merge heads into batch: (b, t, h, dh) -> (b, h, t, dh) -> (b*h, t, dh)
    def merge_heads(z):
        return z.reshape(b, t, heads, dh).transpose(0, 2, 1, 3).reshape(
            b * heads, t, dh)

    qk_bh = merge_heads(qk)
    v_bh = merge_heads(v)
    bh = b * heads

    # ---- LSH hashing (runtime random rotations, as in the reference) ----
    n_buckets = t // bucket_size
    assert t % (bucket_size * 2) == 0 and n_buckets % 2 == 0
    rot = jax.random.normal(rot_key, (1, dh, n_hashes, n_buckets // 2),
                            dtype=jnp.float32)
    rot = jnp.broadcast_to(rot, (bh, dh, n_hashes, n_buckets // 2))
    rotated = jnp.einsum('btf,bfhi->bhti', qk_bh, rot)
    rotated = jnp.concatenate([rotated, -rotated], axis=-1)
    buckets = jnp.argmax(rotated, axis=-1)                       # (bh, nh, t)
    offsets = (jnp.arange(n_hashes) * n_buckets).reshape(1, n_hashes, 1)
    buckets = (buckets + offsets).reshape(bh, n_hashes * t).astype(jnp.int32)

    # ---- sort tokens by (bucket, position) ----
    L = n_hashes * t
    ticker = jnp.broadcast_to(jnp.arange(L, dtype=jnp.int32), (bh, L))
    buckets_and_t = t * buckets + (ticker % t)
    sticker = jnp.argsort(buckets_and_t, axis=-1).astype(jnp.int32)
    undo_sort = jnp.argsort(sticker, axis=-1).astype(jnp.int32)
    st = (sticker % t).astype(jnp.int32)

    sqk = jnp.take_along_axis(qk_bh, st[:, :, None], axis=1)     # (bh, L, dh)
    sv = jnp.take_along_axis(v_bh, st[:, :, None], axis=1)

    chunk_size = n_hashes * n_buckets
    W = bucket_size
    bq_t = st.reshape(bh, chunk_size, W)
    bqk = sqk.reshape(bh, chunk_size, W, dh)
    bv_ = sv.reshape(bh, chunk_size, W, dh)

    # ---- per-chunk attention (Pallas kernel; look-one-back done in-kernel) ----
    bo, lse = lsh_chunk_attention(bqk, bv_, bq_t, bh_blocks=2)

    # ---- unsort and combine across hash rounds ----
    so = bo.reshape(bh, L, dh)
    slogits = lse.reshape(bh, L)
    o = jnp.take_along_axis(so, undo_sort[:, :, None], axis=1)
    logits = jnp.take_along_axis(slogits, undo_sort, axis=1)
    o = o.reshape(bh, n_hashes, t, dh)
    logits = logits.reshape(bh, n_hashes, t, 1)
    probs = jnp.exp(
        logits - jax.scipy.special.logsumexp(logits, axis=1, keepdims=True))
    out = jnp.sum(o * probs, axis=1)                             # (bh, t, dh)

    # split heads back: (b, h, t, dh) -> (b, t, h*dh)
    out = out.reshape(b, heads, t, dh).transpose(0, 2, 1, 3).reshape(
        b, t, dim_heads)

    # ---- output projection (Pallas matmul + bias) ----
    out = pallas_linear(out.reshape(b * t, dim_heads),
                        params["w_out"], params["b_out"]).reshape(b, t, e)
    # TODO(synk): dropout / post_attn_dropout omitted (eval mode, p=0.0).
    return out


# ----------------------------------------------------------------------------
# Main
# ----------------------------------------------------------------------------
if __name__ == "__main__":
    # Module config: dim=32, heads=4 (dim_head=8), bucket_size=16, n_hashes=2
    B, T, DIM = 2, 64, 32
    HEADS, BUCKET, NHASH = 4, 16, 2
    DIM_HEADS = DIM  # dim_head * heads

    key = jax.random.PRNGKey(0)
    k_x, k_qk, k_v, k_o, k_ob, k_rot = jax.random.split(key, 6)

    x = jax.random.normal(k_x, (B, T, DIM), dtype=jnp.float32)

    # Deterministic parameter init (shapes from the module's __init__).
    params = {
        "w_qk": jax.random.normal(k_qk, (DIM, DIM_HEADS), jnp.float32)
        / jnp.sqrt(DIM),
        "w_v": jax.random.normal(k_v, (DIM, DIM_HEADS), jnp.float32)
        / jnp.sqrt(DIM),
        "w_out": jax.random.normal(k_o, (DIM_HEADS, DIM), jnp.float32)
        / jnp.sqrt(DIM_HEADS),
        "b_out": jax.random.normal(k_ob, (DIM,), jnp.float32) * 0.01,
    }

    out = lsh_self_attention_forward(
        x, params, heads=HEADS, bucket_size=BUCKET, n_hashes=NHASH,
        rot_key=k_rot)
    out = jax.block_until_ready(out)
    assert out.shape == (B, T, DIM), out.shape
    assert bool(jnp.all(jnp.isfinite(out)))
    print("KERNEL_OK")
</pallas_src>

<mosaic_0001>
module attributes {stable_mosaic.version = 11 : i64} {
  func.func @_matmul_kernel(%arg0: i32, %arg1: memref<64x32xf32, #tpu.memory_space<vmem>>, %arg2: memref<32x64xf32, #tpu.memory_space<vmem>>, %arg3: memref<64x64xf32, #tpu.memory_space<vmem>>) attributes {dimension_semantics = [#tpu.dimension_semantics<parallel>], iteration_bounds = array<i64: 2>, scalar_prefetch = 0 : i64, scratch_operands = 0 : i64, tpu.core_type = #tpu.core_type<tc>, window_params = [{transform_indices = @transform_0, window_bounds = array<i64: 64, 32>}, {pipeline_mode = #tpu.pipeline_mode<synchronous>, transform_indices = @transform_1, window_bounds = array<i64: 32, 64>}, {transform_indices = @transform_2, window_bounds = array<i64: 64, 64>}]} {
    %c0 = arith.constant 0 : index
    %c0_0 = arith.constant 0 : index
    %0 = vector.load %arg1[%c0, %c0_0] : memref<64x32xf32, #tpu.memory_space<vmem>>, vector<64x32xf32>
    %c0_1 = arith.constant 0 : index
    %c0_2 = arith.constant 0 : index
    %1 = vector.load %arg2[%c0_1, %c0_2] : memref<32x64xf32, #tpu.memory_space<vmem>>, vector<32x64xf32>
    %cst = arith.constant dense<0.000000e+00> : vector<64x64xf32>
    %2 = tpu.matmul %0, %1, %cst {dimension_numbers = #tpu.dot_dimension_numbers<[1], [0], [0], [1], [0, 0, 1, 1], [], []>} : vector<64x32xf32>, vector<32x64xf32>, vector<64x64xf32> -> vector<64x64xf32>
    %c0_3 = arith.constant 0 : index
    %c0_4 = arith.constant 0 : index
    %3 = vector.load %arg3[%c0_3, %c0_4] : memref<64x64xf32, #tpu.memory_space<vmem>>, vector<64x64xf32>
    tpu.vector_store %arg3[%c0_3, %c0_4], %2 {strides = array<i32>} : memref<64x64xf32, #tpu.memory_space<vmem>>, vector<64x64xf32>,
    return
  }
  func.func @transform_0(%arg0: i32) -> (i32, i32) {
    %c0_i32 = arith.constant 0 : i32
    %c0_i32_0 = arith.constant 0 : i32
    return %arg0, %c0_i32 : i32, i32
  }
  func.func @transform_1(%arg0: i32) -> (i32, i32) {
    %c0_i32 = arith.constant 0 : i32
    %c0_i32_0 = arith.constant 0 : i32
    %c0_i32_1 = arith.constant 0 : i32
    return %c0_i32, %c0_i32_0 : i32, i32
  }
  func.func @transform_2(%arg0: i32) -> (i32, i32) {
    %c0_i32 = arith.constant 0 : i32
    %c0_i32_0 = arith.constant 0 : i32
    return %arg0, %c0_i32 : i32, i32
  }
}

</mosaic_0001>

<bundles_post_ra>
// kernel: tpu_custom_call.1
= control target key start
LH: loop header
LB: loop body
LE: loop exit
PB: predicated region body
PF: predicated region fallthrough
CT: control target
= control target key end

     0   :  { %s444_s9 = smov 0   ;;  %s492_s0 = inlined_call_operand.vmem [shape: f32[128,32], index: 0, kind: input, shape index: {}]   ;;  %s493_s1 = inlined_call_operand.vmem [shape: f32[32,64], index: 1, kind: input, shape index: {}]   ;;  %s494_s2 = inlined_call_operand.vmem [shape: f32[128,64], index: 2, kind: output, shape index: {}]  }
   0x1 LB: > { %s354_s10 = sadd.s32 4294967295, %s427_s9   ;;  %p358_p0 = scmp.ge.s32.totalorder %s427_s9, 1  ;;  %s427_s9 = sphi %s444_s9, %s12_s9  }
   0x2   : > { %p113_p1 = scmp.lt.s32.totalorder %s427_s9, 3 }
   0x4   : > { %p114_p2 = pnand %p358_p0, %p113_p1 }
   0x5   : > { %s359_s15 = sshll.u32 (!%p114_p2), %s354_s10, 3 }
   0x6   : > { %117 = sbr.rel (%p114_p2) target bundleno = 221 (0xdd), region = 28  ;;  %p136_p3 = scmp.lt.s32.totalorder (!%p114_p2), %s359_s15, 15 }
   0xb   : > { %v158_v0 = vld [vmem:[%s493_s1 + $0x18] sm:$0xff]  ;;  %v157_v1 = vld [vmem:[%s493_s1 + $0x10] sm:$0xff]  ;;  %v156_v2 = vld [vmem:[%s493_s1 + $0x8] sm:$0xff]  ;;  %s496_s15 = smov (!%p136_p3, %s359_s15), 15  ;;  %vm159_vm0 = vcmask 261120   ;;  %vm289_vm1 = vcmask 523264  }
   0xc   : > { %385 = vmatprep.subr.mxu0 %v158_v0  ;;  %405 = vmatprep.subr.mxu1 %v158_v0  ;;  %v155_v3 = vld [vmem:[%s493_s1] sm:$0xff]  ;;  %s360_s20 = sshll.u32 %s496_s15, 3 }
   0xd   : > { %386 = vmatpush3.msra.mxu0 %v158_v0  ;;  %409 = vmatpush3.msra.mxu1 %v158_v0  ;;  %s139_s23 = scalar_lea.vmem %s492_s0, %s360_s20  ;;  %s145_s26 = scalar_lea.vmem %s494_s2, %s360_s20 }
   0xe   : > { %387 = vmatprep.subr.mxu0 %v157_v1  ;;  %406 = vmatprep.subr.mxu1 %v157_v1  ;;  %v147_v4 = vld [vmem:[%s139_s23] sm:$0xff]  ;;  %v148_v6 = vld [vmem:[%s139_s23 + $0x8] sm:$0xff]  ;;  %v149_v8 = vld [vmem:[%s139_s23 + $0x10] sm:$0xff] }
   0xf   : > { %388 = vmatpush3.msra.mxu0 %v157_v1  ;;  %410 = vmatpush3.msra.mxu1 %v157_v1  ;;  %v151_v5 = vld [vmem:[%s139_s23 + $0x20] sm:$0xff]  ;;  %v152_v7 = vld [vmem:[%s139_s23 + $0x28] sm:$0xff]  ;;  %v153_v9 = vld [vmem:[%s139_s23 + $0x30] sm:$0xff] }
  0x10   : > { %389 = vmatprep.subr.mxu0 %v156_v2  ;;  %407 = vmatprep.subr.mxu1 %v156_v2  ;;  %v150_v10 = vld [vmem:[%s139_s23 + $0x18] sm:$0xff] }
  0x11   : > { %390 = vmatpush3.msra.mxu0 %v156_v2  ;;  %411 = vmatpush3.msra.mxu1 %v156_v2  ;;  %v154_v11 = vld [vmem:[%s139_s23 + $0x38] sm:$0xff] }
  0x12   : > { %391 = vmatprep.subr.mxu0 %v155_v3  ;;  %408 = vmatprep.subr.mxu1 %v155_v3 }
  0x13   : > { %392 = vmatpush3.msra.mxu0 %v155_v3  ;;  %412 = vmatpush3.msra.mxu1 %v155_v3 }
  0x14   : > { %393 = vmatprep.mubr.msk.f32.mxu0 %vm159_vm0, %v147_v4  ;;  %399 = vmatprep.mubr.msk.f32.mxu1 %vm159_vm0, %v151_v5 }
  0x15   : > { %394 = vmatmul.mubr.msk.f32.vlgmr.msra.gmra.mxu0 %vm159_vm0, %v148_v6  ;;  %400 = vmatmul.mubr.msk.f32.vlgmr.msra.gmra.mxu1 %vm159_vm0, %v152_v7 }
  0x16   : > { %396 = vmatprep.mubr.msk.f32.mxu0 %vm159_vm0, %v149_v8  ;;  %402 = vmatprep.mubr.msk.f32.mxu1 %vm159_vm0, %v153_v9 }
  0x19   : > { %397 = vmatmul.mubr.msk.f32.gmra.mxu0 %vm159_vm0, %v150_v10  ;;  %403 = vmatmul.mubr.msk.f32.gmra.mxu1 %vm159_vm0, %v154_v11 }
  0xd5   : > { %v395_v12 = vpop.f32.mrf.mxu0  ;;  %v401_v13 = vpop.f32.mrf.mxu1 }
  0xd6   : > { %291 = vst.msk [vmem:[%s145_s26 + $0x8] sm:$0xff] %vm289_vm1, %v395_v12  ;;  %295 = vst.msk [vmem:[%s145_s26 + $0x28] sm:$0xff] %vm289_vm1, %v401_v13 }
  0xd7   : > { %v250_v14 = vpop.f32.mrf.mxu0  ;;  %v270_v15 = vpop.f32.mrf.mxu1 }
  0xd8   : > { %290 = vst.msk [vmem:[%s145_s26] sm:$0xff] %vm289_vm1, %v250_v14  ;;  %294 = vst.msk [vmem:[%s145_s26 + $0x20] sm:$0xff] %vm289_vm1, %v270_v15 }
  0xd9   : > { %v398_v16 = vpop.f32.mrf.mxu0  ;;  %v404_v17 = vpop.f32.mrf.mxu1 }
  0xda   : > { %293 = vst.msk [vmem:[%s145_s26 + $0x18] sm:$0xff] %vm289_vm1, %v398_v16  ;;  %297 = vst.msk [vmem:[%s145_s26 + $0x38] sm:$0xff] %vm289_vm1, %v404_v17 }
  0xdb   : > { %v260_v18 = vpop.f32.mrf.mxu0  ;;  %v280_v19 = vpop.f32.mrf.mxu1 }
  0xdc   : > { %292 = vst.msk [vmem:[%s145_s26 + $0x10] sm:$0xff] %vm289_vm1, %v260_v18  ;;  %296 = vst.msk [vmem:[%s145_s26 + $0x30] sm:$0xff] %vm289_vm1, %v280_v19 }
  0xdd PF: > { %s12_s9 = sadd.s32 1, %s427_s9  }
  0xde   : > { %p9_p4 = scmp.ge.s32.totalorder %s12_s9, 4  }
  0xe0   :  { %11 = sbr.rel (!%p9_p4) target bundleno = 1 (0x1), region = 58 }

</bundles_post_ra>
